<compile_context>
chip_gen: v6e
topology: v6e:2x2x1
jax: 0.10.0
libtpu: 0.0.40
codegen_flags: <defaults>
</compile_context>

<pallas_src>
import functools

import jax
import jax.numpy as jnp
from jax.experimental import pallas as pl
from jax.experimental.pallas import tpu as pltpu

_EPS = 1e-8  # nn.CosineSimilarity default eps


def _round_up(a, b):
    return ((a + b - 1) // b) * b


def _sublane(dtype):
    # 8 rows for 32-bit, 16 for bf16/f16, 32 for int8/fp8.
    return 8 * max(1, 4 // jnp.dtype(dtype).itemsize)


def _cosine_sim_kernel(x_ref, yT_ref, xs_ref, ys_ref, o_ref):
    # x_ref: (tm, Hp), yT_ref: (Hp, tn), xs_ref: (tm, 1) f32, ys_ref: (1, tn) f32
    dots = jnp.dot(x_ref[...], yT_ref[...],
                   preferred_element_type=jnp.float32)          # (tm, tn) f32
    o_ref[...] = (dots * xs_ref[...] * ys_ref[...]).astype(o_ref.dtype)


def _footprint_bytes(tm, tn, hp, in_itemsize, out_itemsize):
    # double-buffered x tile + y tile + output tile + tiny scale vectors
    return (2 * (tm * hp + hp * tn) * in_itemsize
            + 2 * tm * tn * out_itemsize
            + 2 * (tm + tn) * 4)


def similarity(x, y, temp, *, tm_max=1024, tn_max=256,
               matmul_dtype=None, out_dtype=None):
    """Pallas equivalent of Similarity(temp)(x, y) for x:(M,1,H), y:(1,N,H)."""
    assert x.ndim == 3 and y.ndim == 3, "expected x:(M,1,H), y:(1,N,H)"
    assert x.shape[1] == 1 and y.shape[0] == 1 and x.shape[2] == y.shape[2]
    M, _, H = x.shape
    N = y.shape[1]

    x2d = x.reshape(M, H)
    y2d = y.reshape(N, H)

    # Inverse norms (and 1/temp) precomputed once, outside the grid loop.
    xf = x2d.astype(jnp.float32)
    yf = y2d.astype(jnp.float32)
    inv_temp = jnp.float32(1.0 / float(temp))
    xs = jax.lax.rsqrt(jnp.maximum(jnp.sum(xf * xf, axis=-1, keepdims=True),
                                   _EPS * _EPS)) * inv_temp          # (M, 1)
    ys = jax.lax.rsqrt(jnp.maximum(jnp.sum(yf * yf, axis=-1, keepdims=True),
                                   _EPS * _EPS)).reshape(1, N)       # (1, N)

    # Compute / output dtypes.
    cdtype = jnp.dtype(matmul_dtype) if matmul_dtype is not None else x2d.dtype
    odtype = jnp.dtype(out_dtype) if out_dtype is not None else x2d.dtype
    if x2d.dtype != cdtype:
        x2d = x2d.astype(cdtype)
        y2d = y2d.astype(cdtype)
    c_itemsize = cdtype.itemsize
    o_itemsize = odtype.itemsize

    # Lane/sublane-friendly padded extents and tile sizes.
    sub = max(_sublane(cdtype), _sublane(odtype))
    Hp = _round_up(H, 128)
    tm = min(_round_up(tm_max, sub), _round_up(M, sub))   # sublane tile (rows)
    tn = min(_round_up(tn_max, 128), _round_up(N, 128))   # lane-dense output tile

    # Per-generation VMEM budget (v7x has 64 MiB; v5e/v6e have 128 MiB).
    try:
        vmem_cap = int(pltpu.get_tpu_info().vmem_capacity_bytes)
    except Exception:
        vmem_cap = 64 << 20
    if vmem_cap <= (64 << 20):
        vmem_budget, vmem_limit_cap = 40 << 20, 48 << 20
    else:
        vmem_budget, vmem_limit_cap = 96 << 20, 100 << 20

    # Shrink tiles (tm first, then tn) until the double-buffered set fits.
    while _footprint_bytes(tm, tn, Hp, c_itemsize, o_itemsize) > vmem_budget:
        if tm > sub:
            tm = max(sub, (tm // 2) // sub * sub)
        elif tn > 128:
            tn = max(128, (tn // 2) // 128 * 128)
        else:
            break  # minimal tiles; only reachable for extremely large H

    Mp = _round_up(M, tm)
    Np = _round_up(N, tn)

    # Pad operands (zero rows/cols only affect output rows/cols sliced off).
    if (Mp, Hp) != (M, H):
        x2d = jnp.pad(x2d, ((0, Mp - M), (0, Hp - H)))
    yT = y2d.T                                                   # (H, N)
    if (Hp, Np) != (H, N):
        yT = jnp.pad(yT, ((0, Hp - H), (0, Np - N)))
    if Mp != M:
        xs = jnp.pad(xs, ((0, Mp - M), (0, 0)))
    if Np != N:
        ys = jnp.pad(ys, ((0, 0), (0, Np - N)))

    gi, gj = Mp // tm, Np // tn

    vmem_limit = int(min(
        vmem_limit_cap,
        max(32 << 20,
            _footprint_bytes(tm, tn, Hp, c_itemsize, o_itemsize) + (16 << 20)),
    ))

    cost = pl.CostEstimate(
        flops=2 * Mp * Np * Hp,
        transcendentals=0,
        bytes_accessed=((Mp * Hp + gi * Np * Hp) * c_itemsize
                        + Mp * Np * o_itemsize + (Mp + gi * Np) * 4),
    )

    out = pl.pallas_call(
        _cosine_sim_kernel,
        out_shape=jax.ShapeDtypeStruct((Mp, Np), odtype),
        grid_spec=pltpu.PrefetchScalarGridSpec(
            num_scalar_prefetch=0,
            grid=(gi, gj),
            in_specs=[
                pl.BlockSpec((tm, Hp), lambda i, j: (i, 0)),   # x tile
                pl.BlockSpec((Hp, tn), lambda i, j: (0, j)),   # y^T tile (NN dot)
                pl.BlockSpec((tm, 1), lambda i, j: (i, 0)),    # x row scale * 1/temp
                pl.BlockSpec((1, tn), lambda i, j: (0, j)),    # y col scale
            ],
            out_specs=pl.BlockSpec((tm, tn), lambda i, j: (i, j)),
        ),
        compiler_params=pltpu.CompilerParams(
            # No scratch / cross-iteration state -> both axes may shard freely.
            dimension_semantics=("parallel", "parallel"),
            vmem_limit_bytes=vmem_limit,
        ),
        cost_estimate=cost,
    )(x2d, yT, xs, ys)

    return out[:M, :N]


def _reference(x, y, temp):
    # Pure-JAX reference matching torch.nn.CosineSimilarity(dim=-1) broadcasting.
    xf = x.astype(jnp.float32)
    yf = y.astype(jnp.float32)
    dots = jnp.sum(xf * yf, axis=-1)
    xn = jnp.maximum(jnp.linalg.norm(xf, axis=-1), _EPS)
    yn = jnp.maximum(jnp.linalg.norm(yf, axis=-1), _EPS)
    return dots / (xn * yn) / temp


if __name__ == "__main__":
    key = jax.random.PRNGKey(0)
    kx, ky = jax.random.split(key)

    M, N, H = 8, 8, 32
    temp = 0.05  # typical SimCSE temperature

    x = jax.random.normal(kx, (M, 1, H), dtype=jnp.float32)
    y = jax.random.normal(ky, (1, N, H), dtype=jnp.float32)

    # f32 path
    out = jax.block_until_ready(similarity(x, y, temp))
    ref = _reference(x, y, temp)
    assert out.shape == (M, N) and out.dtype == jnp.float32
    assert jnp.allclose(out, ref, atol=1e-4, rtol=1e-4), "f32 mismatch vs reference"

    # bf16 path (dtype-matched output, 16-row sublane tiling)
    xb = x.astype(jnp.bfloat16)
    yb = y.astype(jnp.bfloat16)
    outb = jax.block_until_ready(similarity(xb, yb, temp))
    refb = _reference(xb, yb, temp)
    assert outb.shape == (M, N) and outb.dtype == jnp.bfloat16
    assert jnp.allclose(outb.astype(jnp.float32), refb, atol=0.25, rtol=0.05), \
        "bf16 mismatch vs reference"

    print("KERNEL_OK")
</pallas_src>

<mosaic_0001>
module attributes {stable_mosaic.version = 11 : i64} {
  func.func @_cosine_sim_kernel(%arg0: i32, %arg1: i32, %arg2: memref<8x128xf32, #tpu.memory_space<vmem>>, %arg3: memref<128x128xf32, #tpu.memory_space<vmem>>, %arg4: memref<8x1xf32, #tpu.memory_space<vmem>>, %arg5: memref<1x128xf32, #tpu.memory_space<vmem>>, %arg6: memref<8x128xf32, #tpu.memory_space<vmem>>) attributes {dimension_semantics = [#tpu.dimension_semantics<parallel>, #tpu.dimension_semantics<parallel>], iteration_bounds = array<i64: 1, 1>, scalar_prefetch = 0 : i64, scratch_operands = 0 : i64, tpu.core_type = #tpu.core_type<tc>, window_params = [{transform_indices = @transform_0, window_bounds = array<i64: 8, 128>}, {transform_indices = @transform_1, window_bounds = array<i64: 128, 128>}, {transform_indices = @transform_2, window_bounds = array<i64: 8, 1>}, {transform_indices = @transform_3, window_bounds = array<i64: 1, 128>}, {transform_indices = @transform_4, window_bounds = array<i64: 8, 128>}]} {
    %c0 = arith.constant 0 : index
    %c0_0 = arith.constant 0 : index
    %0 = vector.load %arg2[%c0, %c0_0] : memref<8x128xf32, #tpu.memory_space<vmem>>, vector<8x128xf32>
    %c0_1 = arith.constant 0 : index
    %c0_2 = arith.constant 0 : index
    %1 = vector.load %arg3[%c0_1, %c0_2] : memref<128x128xf32, #tpu.memory_space<vmem>>, vector<128x128xf32>
    %cst = arith.constant dense<0.000000e+00> : vector<8x128xf32>
    %2 = tpu.matmul %0, %1, %cst {dimension_numbers = #tpu.dot_dimension_numbers<[1], [0], [0], [1], [0, 0, 1, 1], [], []>} : vector<8x128xf32>, vector<128x128xf32>, vector<8x128xf32> -> vector<8x128xf32>
    %c0_3 = arith.constant 0 : index
    %c0_4 = arith.constant 0 : index
    %3 = vector.load %arg4[%c0_3, %c0_4] : memref<8x1xf32, #tpu.memory_space<vmem>>, vector<8x1xf32>
    %4 = vector.broadcast %3 : vector<8x1xf32> to vector<8x128xf32>
    %5 = arith.mulf %2, %4 : vector<8x128xf32>
    %c0_5 = arith.constant 0 : index
    %c0_6 = arith.constant 0 : index
    %6 = vector.load %arg5[%c0_5, %c0_6] : memref<1x128xf32, #tpu.memory_space<vmem>>, vector<1x128xf32>
    %7 = vector.broadcast %6 : vector<1x128xf32> to vector<8x128xf32>
    %8 = arith.mulf %5, %7 : vector<8x128xf32>
    %c0_7 = arith.constant 0 : index
    %c0_8 = arith.constant 0 : index
    %9 = vector.load %arg6[%c0_7, %c0_8] : memref<8x128xf32, #tpu.memory_space<vmem>>, vector<8x128xf32>
    tpu.vector_store %arg6[%c0_7, %c0_8], %8 {strides = array<i32>} : memref<8x128xf32, #tpu.memory_space<vmem>>, vector<8x128xf32>,
    return
  }
  func.func @transform_0(%arg0: i32, %arg1: i32) -> (i32, i32) {
    %c0_i32 = arith.constant 0 : i32
    %c0_i32_0 = arith.constant 0 : i32
    return %arg0, %c0_i32 : i32, i32
  }
  func.func @transform_1(%arg0: i32, %arg1: i32) -> (i32, i32) {
    %c0_i32 = arith.constant 0 : i32
    %c0_i32_0 = arith.constant 0 : i32
    return %c0_i32, %arg1 : i32, i32
  }
  func.func @transform_2(%arg0: i32, %arg1: i32) -> (i32, i32) {
    %c0_i32 = arith.constant 0 : i32
    %c0_i32_0 = arith.constant 0 : i32
    return %arg0, %c0_i32 : i32, i32
  }
  func.func @transform_3(%arg0: i32, %arg1: i32) -> (i32, i32) {
    %c0_i32 = arith.constant 0 : i32
    %c0_i32_0 = arith.constant 0 : i32
    return %c0_i32, %arg1 : i32, i32
  }
  func.func @transform_4(%arg0: i32, %arg1: i32) -> (i32, i32) {
    %c0_i32 = arith.constant 0 : i32
    return %arg0, %arg1 : i32, i32
  }
}

</mosaic_0001>

<bundles_post_ra>
// kernel: tpu_custom_call.1
= control target key start
LH: loop header
LB: loop body
LE: loop exit
PB: predicated region body
PF: predicated region fallthrough
CT: control target
= control target key end

     0   :  { %9 = vsyncpa [#allocation3], 0  ;;  %s302_s0 = inlined_call_operand.vmem [shape: f32[8,128], index: 0, kind: input, shape index: {}]   ;;  %s303_s1 = inlined_call_operand.hbm [shape: f32[128,128], index: 1, kind: input, shape index: {}]   ;;  %s304_s2 = inlined_call_operand.vmem [shape: f32[8,1], index: 2, kind: input, shape index: {}]   ;;  %s305_s3 = inlined_call_operand.vmem [shape: f32[1,128], index: 3, kind: input, shape index: {}]   ;;  %s306_s4 = inlined_call_operand.hbm [shape: f32[8,128], index: 4, kind: output, shape index: {}]  }
   0x1   :  { %10 = vsyncpa [#allocation4], 0  ;;  %s255_s15 = smov [#allocation2]  }
   0x2   :  { %s18_s16 = sshll.u32 %s255_s15, 4  ;;  %s19_s16 = int_to_ptr.vmem [resolvable:$true] %s18_s16 }
   0x3   :  { %s219_s17 = scalar_lea.vmem %s19_s16, 2048  ;;  %p224_p1 = scmp.lt.s32.totalorder %s19_s16, %s19_s16 }
   0x4   :  { %p220_p0 = scmp.ne.s32.totalorder %s19_s16, %s219_s17  ;;  %p225_p2 = scmp.lt.s32.totalorder %s219_s17, %s219_s17 }
   0x6   :  { %p226_p3 = por %p225_p2, %p224_p1 }
   0x8   :  { %p227_p4 = pnand %p226_p3, %p220_p0 }
   0xa   :  { %230 = shalt.err (!%p227_p4)
}
   0xb   :  { %s256_s18 = smov 128   ;;  %s257_s19 = smov 8  }
   0xc   :  { %24 = dma.hbm_to_vmem [thread:$0]  %s303_s1, 2048, %s19_s16, [#allocation3], %s256_s18, %s256_s18, %s257_s19  }
   0xd   :  { %251 = dma.done.wait [#allocation3], 2048  }
   0xe   :  { %252 = vsyncadd [#allocation3], 4294965248  ;;  %v258_v0 = vmov 0.0   ;;  %vm259_vm0 = vmmov 0   ;;  %v260_v1 = vmov 0   ;;  %v48_v2 = vld [vmem:[#allocation2 + $0x78] sm:$0xff] }
   0xf   :  { %168 = vmatprep.subr.mxu0 %v258_v0  ;;  %200 = vmatprep.mubr.msk.f32.mxu0 %vm259_vm0, %v258_v0  ;;  %v47_v3 = vld [vmem:[#allocation2 + $0x70] sm:$0xff]  ;;  %v46_v4 = vld [vmem:[#allocation2 + $0x68] sm:$0xff]  ;;  %v45_v5 = vld [vmem:[#allocation2 + $0x60] sm:$0xff]  ;;  %s261_s26 = smov [#allocation5]  }
  0x10   :  { %210 = vset.pattern.permute.xlu0 %v260_v1  ;;  %169 = vmatpush3.msra.mxu0 %v48_v2  ;;  %v119_v6 = vld [vmem:[%s304_s2] sm:$0xff]  ;;  %v44_v7 = vld [vmem:[#allocation2 + $0x58] sm:$0xff]  ;;  %v43_v8 = vld [vmem:[#allocation2 + $0x50] sm:$0xff]  ;;  %s141_s27 = sshll.u32 %s261_s26, 4  ;;  %s142_s27 = int_to_ptr.vmem [resolvable:$true] %s141_s27 }
  0x11   :  { %170 = vmatprep.subr.mxu0 %v258_v0  ;;  %122 = vperm.xlu0 %210, %v119_v6   ;;  %v42_v9 = vld [vmem:[#allocation2 + $0x48] sm:$0xff]  ;;  %v41_v10 = vld [vmem:[#allocation2 + $0x40] sm:$0xff]  ;;  %v40_v11 = vld [vmem:[#allocation2 + $0x38] sm:$0xff]  ;;  %s231_s28 = scalar_lea.vmem %s142_s27, 128  ;;  %p236_p6 = scmp.lt.s32.totalorder %s142_s27, %s142_s27 }
  0x12   :  { %171 = vmatpush3.msra.mxu0 %v47_v3  ;;  %v39_v12 = vld [vmem:[#allocation2 + $0x30] sm:$0xff]  ;;  %v38_v13 = vld [vmem:[#allocation2 + $0x28] sm:$0xff]  ;;  %v37_v14 = vld [vmem:[#allocation2 + $0x20] sm:$0xff]  ;;  %p232_p5 = scmp.ne.s32.totalorder %s142_s27, %s231_s28  ;;  %p237_p7 = scmp.lt.s32.totalorder %s231_s28, %s231_s28 }
  0x13   :  { %172 = vmatprep.subr.mxu0 %v258_v0  ;;  %v36_v15 = vld [vmem:[#allocation2 + $0x18] sm:$0xff]  ;;  %v35_v16 = vld [vmem:[#allocation2 + $0x10] sm:$0xff]  ;;  %v34_v17 = vld [vmem:[#allocation2 + $0x8] sm:$0xff] }
  0x14   :  { %173 = vmatpush3.msra.mxu0 %v46_v4  ;;  %v33_v18 = vld [vmem:[#allocation2] sm:$0xff]  ;;  %p238_p8 = por %p237_p7, %p236_p6 }
  0x15   :  { %174 = vmatprep.subr.mxu0 %v258_v0  ;;  %v32_v19 = vld [vmem:[%s302_s0] sm:$0xff] }
  0x16   :  { %175 = vmatpush3.msra.mxu0 %v45_v5  ;;  %v150_v22 = vld [vmem:[%s305_s3] ss:$0 sm:$0xff]  ;;  %p239_p9 = pnand %p238_p8, %p232_p5 }
  0x17   :  { %176 = vmatprep.subr.mxu0 %v258_v0 }
  0x18   :  { %177 = vmatpush3.msra.mxu0 %v44_v7 }
  0x19   :  { %178 = vmatprep.subr.mxu0 %v258_v0 }
  0x1a   :  { %179 = vmatpush3.msra.mxu0 %v43_v8 }
  0x1b   :  { %180 = vmatprep.subr.mxu0 %v258_v0 }
  0x1c   :  { %181 = vmatpush3.msra.mxu0 %v42_v9 }
  0x1d   :  { %182 = vmatprep.subr.mxu0 %v258_v0 }
  0x1e   :  { %183 = vmatpush3.msra.mxu0 %v41_v10 }
  0x1f   :  { %184 = vmatprep.subr.mxu0 %v258_v0 }
  0x20   :  { %185 = vmatpush3.msra.mxu0 %v40_v11 }
  0x21   :  { %186 = vmatprep.subr.mxu0 %v258_v0 }
  0x22   :  { %187 = vmatpush3.msra.mxu0 %v39_v12 }
  0x23   :  { %188 = vmatprep.subr.mxu0 %v258_v0 }
  0x24   :  { %189 = vmatpush3.msra.mxu0 %v38_v13 }
  0x25   :  { %190 = vmatprep.subr.mxu0 %v258_v0 }
  0x26   :  { %191 = vmatpush3.msra.mxu0 %v37_v14 }
  0x27   :  { %192 = vmatprep.subr.mxu0 %v258_v0 }
  0x28   :  { %193 = vmatpush3.msra.mxu0 %v36_v15 }
  0x29   :  { %194 = vmatprep.subr.mxu0 %v258_v0 }
  0x2a   :  { %195 = vmatpush3.msra.mxu0 %v35_v16 }
  0x2b   :  { %196 = vmatprep.subr.mxu0 %v258_v0 }
  0x2c   :  { %197 = vmatpush3.msra.mxu0 %v34_v17 }
  0x2d   :  { %198 = vmatprep.subr.mxu0 %v258_v0 }
  0x2e   :  { %199 = vmatpush3.msra.mxu0 %v33_v18 }
  0x2f   :  { %201 = vmatmul.mubr.f32.vlgmr.msra.gmra.mxu0 %v32_v19 }
  0x8c   :  { %v123_v20 = vpop.permute.xlu0 %122 }
  0xef   :  { %v115_v21 = vpop.f32.mrf.mxu0 }
  0xf0   :  { %v125_v23 = vmul.f32 %v123_v20, %v115_v21 }
  0xf1   :  { %v202_v24 = vpop.f32.mrf.mxu0 }
  0xf2   :  { %v133_v25 = vmul.f32 %v150_v22, %v125_v23 }
  0xf4   :  { %134 = vst [vmem:[#allocation5] sm:$0xff] %v133_v25 }
  0xf5   :  { %242 = shalt.err (!%p239_p9)
}
  0xf6   :  { %144 = dma.vmem_to_hbm [thread:$0]  %s142_s27, 128, %s306_s4, [#allocation4]  }
  0xf7   :  { %253 = dma.done.wait [#allocation4], 128  }
  0xf8   :  { %254 = vsyncadd [#allocation4], 4294967168 }
  0xf9   :  { %148 = vsyncpa [#allocation3], 1 }
  0xfa   :  { %149 = vsyncpa [#allocation4], 1 }

</bundles_post_ra>
